<compile_context>
chip_gen: v6e
topology: v6e:2x2x1
jax: 0.10.0
libtpu: 0.0.40
codegen_flags: <defaults>
</compile_context>

<pallas_src>
import functools

import jax
import jax.numpy as jnp
from jax.experimental import pallas as pl
from jax.experimental.pallas import tpu as pltpu

SELU_ALPHA = 1.6732632423543772
SELU_SCALE = 1.0507009873554805

IN_DIM = 784
OUT_DIM = 10
PADDED_OUT_DIM = 128
# Logical (PyTorch) layer shapes and the lane-padded shapes used on-chip.
LAYER_DIMS = [(784, 256), (256, 256), (256, 128), (128, 64), (64, 10)]
PADDED_LAYER_DIMS = [(784, 256), (256, 256), (256, 128), (128, 128), (128, 128)]


def _selu(v):
    # Full SELU (reference path only); the kernel folds SELU_SCALE into the
    # next layer's weights instead.
    return SELU_SCALE * jnp.where(v > 0, v, SELU_ALPHA * (jnp.exp(v) - 1.0))


def mlp_kernel(x_ref,
               w1_ref, b1_ref,
               w2_ref, b2_ref,
               w3_ref, b3_ref,
               w4_ref, b4_ref,
               w5_ref, b5_ref,
               o_ref):
    """Fused MLP: 4x (bf16 matmul + f32 bias + f32 SELU) + final bf16 matmul."""

    def layer(h_bf16, w_ref, b_ref):
        # bf16 operands into the MXU, f32 accumulation; bias added via the
        # implicit (1, N) -> (tb, N) broadcast.
        return jnp.dot(h_bf16, w_ref[...],
                       preferred_element_type=jnp.float32) + b_ref[...]

    def act(v):
        # SELU with its scale folded into the *next* layer's weights:
        #   u(z) = z          , z > 0
        #        = a*(e^z - 1), z <= 0        (f32 math: v5e-safe)
        # TODO(synk): jnp.expm1 would be slightly more accurate near 0 but is
        # not guaranteed to lower on all Mosaic versions; exp(v)-1 is safe.
        return jnp.where(v > 0, v, SELU_ALPHA * (jnp.exp(v) - 1.0))

    h = x_ref[...].astype(jnp.bfloat16)                 # (tb, 784) f32 -> bf16
    h = act(layer(h, w1_ref, b1_ref)).astype(jnp.bfloat16)  # (tb, 256)
    h = act(layer(h, w2_ref, b2_ref)).astype(jnp.bfloat16)  # (tb, 256)
    h = act(layer(h, w3_ref, b3_ref)).astype(jnp.bfloat16)  # (tb, 128)
    h = act(layer(h, w4_ref, b4_ref)).astype(jnp.bfloat16)  # (tb, 128) cols 64+ are 0
    o_ref[...] = layer(h, w5_ref, b5_ref).astype(o_ref.dtype)  # (tb, 128) cols 10+ are 0


def init_params(key):
    """PyTorch-default-style init (uniform +-1/sqrt(fan_in)), deterministic."""
    params = []
    for (fan_in, fan_out) in LAYER_DIMS:
        key, kw, kb = jax.random.split(key, 3)
        bound = 1.0 / jnp.sqrt(fan_in)
        # torch.nn.Linear weight is (out, in); we store its transpose (in, out).
        w = jax.random.uniform(kw, (fan_in, fan_out), jnp.float32, -bound, bound)
        b = jax.random.uniform(kb, (1, fan_out), jnp.float32, -bound, bound)
        params.append((w, b))
    return params


def _pad2d(a, rows, cols):
    return jnp.pad(a, ((0, rows - a.shape[0]), (0, cols - a.shape[1])))


def prepare_params(params):
    """One-time preprocessing: lane-pad narrow tail layers to 128, cast weights
    to bf16, keep biases f32, and fold SELU_SCALE of the previous activation
    into W2..W5. Zero padding keeps the math exact (SELU(0)=0; zero rows/cols
    contribute nothing)."""
    flat = []
    for idx, ((w, b), (pin, pout)) in enumerate(zip(params, PADDED_LAYER_DIMS)):
        w = w.astype(jnp.float32)
        if idx > 0:  # absorb the scale of the SELU that feeds this layer
            w = w * SELU_SCALE
        w_p = _pad2d(w, pin, pout).astype(jnp.bfloat16)
        b_p = _pad2d(b.astype(jnp.float32).reshape(1, -1), 1, pout)
        flat += [w_p, b_p]
    return tuple(jax.device_put(a) for a in flat)


def choose_tb(B, tb_max=512, min_grid=2):
    """Batch-tile heuristic: multiple of 8, <= tb_max (multiple of 256 for big
    batches), and — when the batch is large enough — at least `min_grid` grid
    steps so both v7x TensorCores get work. tb_max=512 keeps the double-
    buffered f32 x tile well inside v5e's 16 MiB scoped VMEM."""
    b8 = pl.cdiv(B, 8) * 8
    if b8 <= 256:
        return b8
    tb = min(tb_max, pl.cdiv(b8, 256) * 256)
    while tb > 256 and pl.cdiv(b8, tb) < min_grid:
        tb -= 256
    return tb


@functools.partial(jax.jit, static_argnames=("tb",))
def digit_net_forward(x, flat_params, *, tb):
    B = x.shape[0]
    xf = x.reshape(B, -1)  # contiguous reshape, stays f32 — no HBM round trip
    assert xf.shape[1] == IN_DIM

    grid = (pl.cdiv(B, tb),)  # ragged last block: OOB output rows are masked

    # x / out are tiled over the batch (double-buffered); weights & biases are
    # grid-invariant, so a single VMEM buffer each (DMA'd once).
    x_spec = pl.BlockSpec((tb, IN_DIM), lambda i: (i, 0))
    param_specs = []
    for (pin, pout) in PADDED_LAYER_DIMS:
        param_specs.append(
            pl.BlockSpec((pin, pout), lambda i: (0, 0),
                         pipeline_mode=pl.Buffered(1)))
        param_specs.append(
            pl.BlockSpec((1, pout), lambda i: (0, 0),
                         pipeline_mode=pl.Buffered(1)))
    out_spec = pl.BlockSpec((tb, PADDED_OUT_DIM), lambda i: (i, 0))

    flops = 2 * B * sum(pi * po for pi, po in PADDED_LAYER_DIMS)
    transcendentals = B * sum(po for _, po in PADDED_LAYER_DIMS[:-1])
    bytes_accessed = (
        B * IN_DIM * 4                               # f32 input, read once
        + B * PADDED_OUT_DIM * 2                     # bf16 output
        + sum(pi * po * 2 + po * 4 for pi, po in PADDED_LAYER_DIMS))

    out = pl.pallas_call(
        mlp_kernel,
        out_shape=jax.ShapeDtypeStruct((B, PADDED_OUT_DIM), jnp.bfloat16),
        grid_spec=pltpu.PrefetchScalarGridSpec(
            num_scalar_prefetch=0,
            grid=grid,
            in_specs=[x_spec] + param_specs,
            out_specs=out_spec,
        ),
        compiler_params=pltpu.CompilerParams(
            dimension_semantics=("parallel",),
        ),
        cost_estimate=pl.CostEstimate(
            flops=int(flops),
            transcendentals=int(transcendentals),
            bytes_accessed=int(bytes_accessed),
        ),
    )(xf, *flat_params)

    return out[:, :OUT_DIM].astype(jnp.float32)


def digit_net(x, flat_params, *, tb=None):
    if tb is None:
        tb = choose_tb(x.shape[0])
    return digit_net_forward(x, flat_params, tb=tb)


def digit_net_reference(x, params):
    """Pure-JAX reference using the same bf16-operand / f32-accum recipe."""
    h = x.reshape(x.shape[0], -1).astype(jnp.float32)
    for i, (w, b) in enumerate(params):
        z = jnp.dot(h.astype(jnp.bfloat16), w.astype(jnp.bfloat16),
                    preferred_element_type=jnp.float32) + b
        h = _selu(z) if i < len(params) - 1 else z
    return h


if __name__ == "__main__":
    key = jax.random.PRNGKey(0)
    kx, kx2, kp = jax.random.split(key, 3)

    params = init_params(kp)
    flat_params = prepare_params(params)  # one-time pad / cast / scale-fold

    # Small MNIST-like batch: (B, C, H, W) = (8, 1, 28, 28) -> flattens to 784.
    x = jax.random.normal(kx, (8, 1, 28, 28), dtype=jnp.float32)
    out = jax.block_until_ready(digit_net(x, flat_params))
    ref = digit_net_reference(x, params)
    assert out.shape == (8, 10)
    assert jnp.allclose(out, ref, atol=2e-2, rtol=2e-2), "mismatch vs JAX reference"

    # Ragged multi-step grid check (B=200, tb=128 -> 2 grid steps, last ragged).
    x2 = jax.random.normal(kx2, (200, 1, 28, 28), dtype=jnp.float32)
    out2 = jax.block_until_ready(digit_net(x2, flat_params, tb=128))
    ref2 = digit_net_reference(x2, params)
    assert out2.shape == (200, 10)
    assert jnp.allclose(out2, ref2, atol=2e-2, rtol=2e-2), "ragged-batch mismatch"

    print("KERNEL_OK")
</pallas_src>

<mosaic_0001>
module attributes {stable_mosaic.version = 11 : i64} {
  func.func @mlp_kernel(%arg0: i32, %arg1: memref<8x784xf32, #tpu.memory_space<vmem>>, %arg2: memref<784x256xbf16, #tpu.memory_space<vmem>>, %arg3: memref<1x256xf32, #tpu.memory_space<vmem>>, %arg4: memref<256x256xbf16, #tpu.memory_space<vmem>>, %arg5: memref<1x256xf32, #tpu.memory_space<vmem>>, %arg6: memref<256x128xbf16, #tpu.memory_space<vmem>>, %arg7: memref<1x128xf32, #tpu.memory_space<vmem>>, %arg8: memref<128x128xbf16, #tpu.memory_space<vmem>>, %arg9: memref<1x128xf32, #tpu.memory_space<vmem>>, %arg10: memref<128x128xbf16, #tpu.memory_space<vmem>>, %arg11: memref<1x128xf32, #tpu.memory_space<vmem>>, %arg12: memref<8x128xbf16, #tpu.memory_space<vmem>>) attributes {dimension_semantics = [#tpu.dimension_semantics<parallel>], iteration_bounds = array<i64: 1>, scalar_prefetch = 0 : i64, scratch_operands = 0 : i64, tpu.core_type = #tpu.core_type<tc>, window_params = [{transform_indices = @transform_0, window_bounds = array<i64: 8, 784>}, {pipeline_mode = #tpu.pipeline_mode<synchronous>, transform_indices = @transform_1, window_bounds = array<i64: 784, 256>}, {pipeline_mode = #tpu.pipeline_mode<synchronous>, transform_indices = @transform_2, window_bounds = array<i64: 1, 256>}, {pipeline_mode = #tpu.pipeline_mode<synchronous>, transform_indices = @transform_3, window_bounds = array<i64: 256, 256>}, {pipeline_mode = #tpu.pipeline_mode<synchronous>, transform_indices = @transform_4, window_bounds = array<i64: 1, 256>}, {pipeline_mode = #tpu.pipeline_mode<synchronous>, transform_indices = @transform_5, window_bounds = array<i64: 256, 128>}, {pipeline_mode = #tpu.pipeline_mode<synchronous>, transform_indices = @transform_6, window_bounds = array<i64: 1, 128>}, {pipeline_mode = #tpu.pipeline_mode<synchronous>, transform_indices = @transform_7, window_bounds = array<i64: 128, 128>}, {pipeline_mode = #tpu.pipeline_mode<synchronous>, transform_indices = @transform_8, window_bounds = array<i64: 1, 128>}, {pipeline_mode = #tpu.pipeline_mode<synchronous>, transform_indices = @transform_9, window_bounds = array<i64: 128, 128>}, {pipeline_mode = #tpu.pipeline_mode<synchronous>, transform_indices = @transform_10, window_bounds = array<i64: 1, 128>}, {transform_indices = @transform_11, window_bounds = array<i64: 8, 128>}]} {
    %c0 = arith.constant 0 : index
    %c0_0 = arith.constant 0 : index
    %0 = vector.load %arg1[%c0, %c0_0] : memref<8x784xf32, #tpu.memory_space<vmem>>, vector<8x784xf32>
    %1 = arith.truncf %0 : vector<8x784xf32> to vector<8x784xbf16>
    %c0_1 = arith.constant 0 : index
    %c0_2 = arith.constant 0 : index
    %2 = vector.load %arg2[%c0_1, %c0_2] : memref<784x256xbf16, #tpu.memory_space<vmem>>, vector<784x256xbf16>
    %cst = arith.constant dense<0.000000e+00> : vector<8x256xf32>
    %3 = tpu.matmul %1, %2, %cst {dimension_numbers = #tpu.dot_dimension_numbers<[1], [0], [0], [1], [0, 0, 1, 1], [], []>} : vector<8x784xbf16>, vector<784x256xbf16>, vector<8x256xf32> -> vector<8x256xf32>
    %c0_3 = arith.constant 0 : index
    %c0_4 = arith.constant 0 : index
    %4 = vector.load %arg3[%c0_3, %c0_4] : memref<1x256xf32, #tpu.memory_space<vmem>>, vector<1x256xf32>
    %5 = vector.broadcast %4 : vector<1x256xf32> to vector<8x256xf32>
    %6 = arith.addf %3, %5 : vector<8x256xf32>
    %cst_5 = arith.constant 0.000000e+00 : f32
    %7 = vector.broadcast %cst_5 : f32 to vector<8x256xf32>
    %8 = arith.cmpf ogt, %6, %7 : vector<8x256xf32>
    %9 = math.exp %6 : vector<8x256xf32>
    %cst_6 = arith.constant 1.000000e+00 : f32
    %10 = vector.broadcast %cst_6 : f32 to vector<8x256xf32>
    %11 = arith.subf %9, %10 : vector<8x256xf32>
    %cst_7 = arith.constant 1.67326319 : f32
    %12 = vector.broadcast %cst_7 : f32 to vector<8x256xf32>
    %13 = arith.mulf %12, %11 : vector<8x256xf32>
    %14 = arith.select %8, %6, %13 : vector<8x256xi1>, vector<8x256xf32>
    %15 = arith.truncf %14 : vector<8x256xf32> to vector<8x256xbf16>
    %c0_8 = arith.constant 0 : index
    %c0_9 = arith.constant 0 : index
    %16 = vector.load %arg4[%c0_8, %c0_9] : memref<256x256xbf16, #tpu.memory_space<vmem>>, vector<256x256xbf16>
    %cst_10 = arith.constant dense<0.000000e+00> : vector<8x256xf32>
    %17 = tpu.matmul %15, %16, %cst_10 {dimension_numbers = #tpu.dot_dimension_numbers<[1], [0], [0], [1], [0, 0, 1, 1], [], []>} : vector<8x256xbf16>, vector<256x256xbf16>, vector<8x256xf32> -> vector<8x256xf32>
    %c0_11 = arith.constant 0 : index
    %c0_12 = arith.constant 0 : index
    %18 = vector.load %arg5[%c0_11, %c0_12] : memref<1x256xf32, #tpu.memory_space<vmem>>, vector<1x256xf32>
    %19 = vector.broadcast %18 : vector<1x256xf32> to vector<8x256xf32>
    %20 = arith.addf %17, %19 : vector<8x256xf32>
    %cst_13 = arith.constant 0.000000e+00 : f32
    %21 = vector.broadcast %cst_13 : f32 to vector<8x256xf32>
    %22 = arith.cmpf ogt, %20, %21 : vector<8x256xf32>
    %23 = math.exp %20 : vector<8x256xf32>
    %cst_14 = arith.constant 1.000000e+00 : f32
    %24 = vector.broadcast %cst_14 : f32 to vector<8x256xf32>
    %25 = arith.subf %23, %24 : vector<8x256xf32>
    %cst_15 = arith.constant 1.67326319 : f32
    %26 = vector.broadcast %cst_15 : f32 to vector<8x256xf32>
    %27 = arith.mulf %26, %25 : vector<8x256xf32>
    %28 = arith.select %22, %20, %27 : vector<8x256xi1>, vector<8x256xf32>
    %29 = arith.truncf %28 : vector<8x256xf32> to vector<8x256xbf16>
    %c0_16 = arith.constant 0 : index
    %c0_17 = arith.constant 0 : index
    %30 = vector.load %arg6[%c0_16, %c0_17] : memref<256x128xbf16, #tpu.memory_space<vmem>>, vector<256x128xbf16>
    %cst_18 = arith.constant dense<0.000000e+00> : vector<8x128xf32>
    %31 = tpu.matmul %29, %30, %cst_18 {dimension_numbers = #tpu.dot_dimension_numbers<[1], [0], [0], [1], [0, 0, 1, 1], [], []>} : vector<8x256xbf16>, vector<256x128xbf16>, vector<8x128xf32> -> vector<8x128xf32>
    %c0_19 = arith.constant 0 : index
    %c0_20 = arith.constant 0 : index
    %32 = vector.load %arg7[%c0_19, %c0_20] : memref<1x128xf32, #tpu.memory_space<vmem>>, vector<1x128xf32>
    %33 = vector.broadcast %32 : vector<1x128xf32> to vector<8x128xf32>
    %34 = arith.addf %31, %33 : vector<8x128xf32>
    %cst_21 = arith.constant 0.000000e+00 : f32
    %35 = vector.broadcast %cst_21 : f32 to vector<8x128xf32>
    %36 = arith.cmpf ogt, %34, %35 : vector<8x128xf32>
    %37 = math.exp %34 : vector<8x128xf32>
    %cst_22 = arith.constant 1.000000e+00 : f32
    %38 = vector.broadcast %cst_22 : f32 to vector<8x128xf32>
    %39 = arith.subf %37, %38 : vector<8x128xf32>
    %cst_23 = arith.constant 1.67326319 : f32
    %40 = vector.broadcast %cst_23 : f32 to vector<8x128xf32>
    %41 = arith.mulf %40, %39 : vector<8x128xf32>
    %42 = arith.select %36, %34, %41 : vector<8x128xi1>, vector<8x128xf32>
    %43 = arith.truncf %42 : vector<8x128xf32> to vector<8x128xbf16>
    %c0_24 = arith.constant 0 : index
    %c0_25 = arith.constant 0 : index
    %44 = vector.load %arg8[%c0_24, %c0_25] : memref<128x128xbf16, #tpu.memory_space<vmem>>, vector<128x128xbf16>
    %cst_26 = arith.constant dense<0.000000e+00> : vector<8x128xf32>
    %45 = tpu.matmul %43, %44, %cst_26 {dimension_numbers = #tpu.dot_dimension_numbers<[1], [0], [0], [1], [0, 0, 1, 1], [], []>} : vector<8x128xbf16>, vector<128x128xbf16>, vector<8x128xf32> -> vector<8x128xf32>
    %c0_27 = arith.constant 0 : index
    %c0_28 = arith.constant 0 : index
    %46 = vector.load %arg9[%c0_27, %c0_28] : memref<1x128xf32, #tpu.memory_space<vmem>>, vector<1x128xf32>
    %47 = vector.broadcast %46 : vector<1x128xf32> to vector<8x128xf32>
    %48 = arith.addf %45, %47 : vector<8x128xf32>
    %cst_29 = arith.constant 0.000000e+00 : f32
    %49 = vector.broadcast %cst_29 : f32 to vector<8x128xf32>
    %50 = arith.cmpf ogt, %48, %49 : vector<8x128xf32>
    %51 = math.exp %48 : vector<8x128xf32>
    %cst_30 = arith.constant 1.000000e+00 : f32
    %52 = vector.broadcast %cst_30 : f32 to vector<8x128xf32>
    %53 = arith.subf %51, %52 : vector<8x128xf32>
    %cst_31 = arith.constant 1.67326319 : f32
    %54 = vector.broadcast %cst_31 : f32 to vector<8x128xf32>
    %55 = arith.mulf %54, %53 : vector<8x128xf32>
    %56 = arith.select %50, %48, %55 : vector<8x128xi1>, vector<8x128xf32>
    %57 = arith.truncf %56 : vector<8x128xf32> to vector<8x128xbf16>
    %c0_32 = arith.constant 0 : index
    %c0_33 = arith.constant 0 : index
    %58 = vector.load %arg10[%c0_32, %c0_33] : memref<128x128xbf16, #tpu.memory_space<vmem>>, vector<128x128xbf16>
    %cst_34 = arith.constant dense<0.000000e+00> : vector<8x128xf32>
    %59 = tpu.matmul %57, %58, %cst_34 {dimension_numbers = #tpu.dot_dimension_numbers<[1], [0], [0], [1], [0, 0, 1, 1], [], []>} : vector<8x128xbf16>, vector<128x128xbf16>, vector<8x128xf32> -> vector<8x128xf32>
    %c0_35 = arith.constant 0 : index
    %c0_36 = arith.constant 0 : index
    %60 = vector.load %arg11[%c0_35, %c0_36] : memref<1x128xf32, #tpu.memory_space<vmem>>, vector<1x128xf32>
    %61 = vector.broadcast %60 : vector<1x128xf32> to vector<8x128xf32>
    %62 = arith.addf %59, %61 : vector<8x128xf32>
    %63 = arith.truncf %62 : vector<8x128xf32> to vector<8x128xbf16>
    %c0_37 = arith.constant 0 : index
    %c0_38 = arith.constant 0 : index
    %64 = vector.load %arg12[%c0_37, %c0_38] : memref<8x128xbf16, #tpu.memory_space<vmem>>, vector<8x128xbf16>
    tpu.vector_store %arg12[%c0_37, %c0_38], %63 {strides = array<i32>} : memref<8x128xbf16, #tpu.memory_space<vmem>>, vector<8x128xbf16>,
    return
  }
  func.func @transform_0(%arg0: i32) -> (i32, i32) {
    %c0_i32 = arith.constant 0 : i32
    %c0_i32_0 = arith.constant 0 : i32
    return %arg0, %c0_i32 : i32, i32
  }
  func.func @transform_1(%arg0: i32) -> (i32, i32) {
    %c0_i32 = arith.constant 0 : i32
    %c0_i32_0 = arith.constant 0 : i32
    %c0_i32_1 = arith.constant 0 : i32
    return %c0_i32, %c0_i32_0 : i32, i32
  }
  func.func @transform_2(%arg0: i32) -> (i32, i32) {
    %c0_i32 = arith.constant 0 : i32
    %c0_i32_0 = arith.constant 0 : i32
    %c0_i32_1 = arith.constant 0 : i32
    return %c0_i32, %c0_i32_0 : i32, i32
  }
  func.func @transform_3(%arg0: i32) -> (i32, i32) {
    %c0_i32 = arith.constant 0 : i32
    %c0_i32_0 = arith.constant 0 : i32
    %c0_i32_1 = arith.constant 0 : i32
    return %c0_i32, %c0_i32_0 : i32, i32
  }
  func.func @transform_4(%arg0: i32) -> (i32, i32) {
    %c0_i32 = arith.constant 0 : i32
    %c0_i32_0 = arith.constant 0 : i32
    %c0_i32_1 = arith.constant 0 : i32
    return %c0_i32, %c0_i32_0 : i32, i32
  }
  func.func @transform_5(%arg0: i32) -> (i32, i32) {
    %c0_i32 = arith.constant 0 : i32
    %c0_i32_0 = arith.constant 0 : i32
    %c0_i32_1 = arith.constant 0 : i32
    return %c0_i32, %c0_i32_0 : i32, i32
  }
  func.func @transform_6(%arg0: i32) -> (i32, i32) {
    %c0_i32 = arith.constant 0 : i32
    %c0_i32_0 = arith.constant 0 : i32
    %c0_i32_1 = arith.constant 0 : i32
    return %c0_i32, %c0_i32_0 : i32, i32
  }
  func.func @transform_7(%arg0: i32) -> (i32, i32) {
    %c0_i32 = arith.constant 0 : i32
    %c0_i32_0 = arith.constant 0 : i32
    %c0_i32_1 = arith.constant 0 : i32
    return %c0_i32, %c0_i32_0 : i32, i32
  }
  func.func @transform_8(%arg0: i32) -> (i32, i32) {
    %c0_i32 = arith.constant 0 : i32
    %c0_i32_0 = arith.constant 0 : i32
    %c0_i32_1 = arith.constant 0 : i32
    return %c0_i32, %c0_i32_0 : i32, i32
  }
  func.func @transform_9(%arg0: i32) -> (i32, i32) {
    %c0_i32 = arith.constant 0 : i32
    %c0_i32_0 = arith.constant 0 : i32
    %c0_i32_1 = arith.constant 0 : i32
    return %c0_i32, %c0_i32_0 : i32, i32
  }
  func.func @transform_10(%arg0: i32) -> (i32, i32) {
    %c0_i32 = arith.constant 0 : i32
    %c0_i32_0 = arith.constant 0 : i32
    %c0_i32_1 = arith.constant 0 : i32
    return %c0_i32, %c0_i32_0 : i32, i32
  }
  func.func @transform_11(%arg0: i32) -> (i32, i32) {
    %c0_i32 = arith.constant 0 : i32
    %c0_i32_0 = arith.constant 0 : i32
    return %arg0, %c0_i32 : i32, i32
  }
}

</mosaic_0001>

<bundles_post_ra>
// kernel: digit_net_forward.1
= control target key start
LH: loop header
LB: loop body
LE: loop exit
PB: predicated region body
PF: predicated region fallthrough
CT: control target
= control target key end

     0   :  { %16 = vsyncpa [#allocation3], 0  ;;  %s2612_s0 = inlined_call_operand.vmem [shape: f32[8,784], index: 0, kind: input, shape index: {}]   ;;  %s2613_s1 = inlined_call_operand.vmem [shape: bf16[784,256], index: 1, kind: input, shape index: {}]   ;;  %s2614_s2 = inlined_call_operand.vmem [shape: f32[1,256], index: 2, kind: input, shape index: {}]   ;;  %s2615_s3 = inlined_call_operand.hbm [shape: bf16[256,256], index: 3, kind: input, shape index: {}]   ;;  %s2616_s4 = inlined_call_operand.vmem [shape: f32[1,256], index: 4, kind: input, shape index: {}]   ;;  %s2617_s5 = inlined_call_operand.hbm [shape: bf16[256,128], index: 5, kind: input, shape index: {}]   ;;  %s2618_s6 = inlined_call_operand.vmem [shape: f32[1,128], index: 6, kind: input, shape index: {}]   ;;  %s2619_s7 = inlined_call_operand.hbm [shape: bf16[128,128], index: 7, kind: input, shape index: {}]   ;;  %s2620_s8 = inlined_call_operand.vmem [shape: f32[1,128], index: 8, kind: input, shape index: {}]   ;;  %s2621_s9 = inlined_call_operand.hbm [shape: bf16[128,128], index: 9, kind: input, shape index: {}]   ;;  %s2622_s10 = inlined_call_operand.vmem [shape: f32[1,128], index: 10, kind: input, shape index: {}]   ;;  %s2623_s11 = inlined_call_operand.vmem [shape: bf16[8,128], index: 11, kind: output, shape index: {}]  }
   0x1   :  { %17 = vsyncpa [#allocation5], 0 }
   0x2   :  { %18 = vsyncpa [#allocation8], 0  ;;  %s2157_s17 = smov [#allocation4]  }
   0x3   :  { %s44_s18 = sshll.u32 %s2157_s17, 4  ;;  %s45_s18 = int_to_ptr.vmem [resolvable:$true] %s44_s18 }
   0x4   :  { %s2079_s19 = scalar_lea.vmem %s45_s18, 2048  ;;  %p2084_p1 = scmp.lt.s32.totalorder %s45_s18, %s45_s18 }
   0x5   :  { %p2080_p0 = scmp.ne.s32.totalorder %s45_s18, %s2079_s19  ;;  %p2085_p2 = scmp.lt.s32.totalorder %s2079_s19, %s2079_s19 }
   0x7   :  { %p2086_p3 = por %p2085_p2, %p2084_p1 }
   0x9   :  { %p2087_p4 = pnand %p2086_p3, %p2080_p0 }
   0xb   :  { %2090 = shalt.err (!%p2087_p4)
}
   0xc   :  { %s2158_s20 = smov 64   ;;  %s2159_s21 = smov 4  }
   0xd   :  { %50 = dma.hbm_to_vmem [thread:$0]  %s2617_s5, 2048, %s45_s18, [#allocation5], %s2158_s20, %s2158_s20, %s2159_s21  }
   0xe   :  { %s2160_s24 = smov [#allocation2]  }
   0xf   :  { %s30_s25 = sshll.u32 %s2160_s24, 4  ;;  %s31_s25 = int_to_ptr.vmem [resolvable:$true] %s30_s25 }
  0x10   :  { %s2099_s26 = scalar_lea.vmem %s31_s25, 4096  ;;  %p2104_p6 = scmp.lt.s32.totalorder %s31_s25, %s31_s25 }
  0x11   :  { %p2100_p5 = scmp.ne.s32.totalorder %s31_s25, %s2099_s26  ;;  %p2105_p7 = scmp.lt.s32.totalorder %s2099_s26, %s2099_s26 }
  0x13   :  { %p2106_p8 = por %p2105_p7, %p2104_p6 }
  0x15   :  { %p2107_p9 = pnand %p2106_p8, %p2100_p5 }
  0x17   :  { %2110 = shalt.err (!%p2107_p9)
}
  0x18   :  { %s2161_s27 = smov 128   ;;  %s2162_s28 = smov 8  }
  0x19   :  { %36 = dma.hbm_to_vmem [thread:$0]  %s2615_s3, 4096, %s31_s25, [#allocation3], %s2161_s27, %s2161_s27, %s2162_s28  }
  0x1a   :  { %s2163_s12 = smov [#allocation6]   ;;  %s2164_s14 = smov [#allocation7]  }
  0x1b   :  { %s58_s13 = sshll.u32 %s2163_s12, 4  ;;  %s72_s5 = sshll.u32 %s2164_s14, 4  ;;  %s59_s13 = int_to_ptr.vmem [resolvable:$true] %s58_s13  ;;  %s73_s5 = int_to_ptr.vmem [resolvable:$true] %s72_s5 }
  0x1c   :  { %s2119_s15 = scalar_lea.vmem %s59_s13, 1024  ;;  %p2124_p11 = scmp.lt.s32.totalorder %s59_s13, %s59_s13 }
  0x1d   :  { %p2120_p10 = scmp.ne.s32.totalorder %s59_s13, %s2119_s15  ;;  %p2125_p12 = scmp.lt.s32.totalorder %s2119_s15, %s2119_s15 }
  0x1f   :  { %p2126_p13 = por %p2125_p12, %p2124_p11 }
  0x21   :  { %p2127_p0 = pnand %p2126_p13, %p2120_p10 }
  0x23   :  { %2130 = shalt.err (!%p2127_p0)
}
  0x24   :  { %64 = dma.hbm_to_vmem [thread:$0]  %s2619_s7, 1024, %s59_s13, [#allocation5], %s2158_s20, %s2158_s20, %s2159_s21  }
  0x25   :  { %s2139_s3 = scalar_lea.vmem %s73_s5, 1024  ;;  %p2144_p2 = scmp.lt.s32.totalorder %s73_s5, %s73_s5 }
  0x26   :  { %p2140_p1 = scmp.ne.s32.totalorder %s73_s5, %s2139_s3  ;;  %p2145_p3 = scmp.lt.s32.totalorder %s2139_s3, %s2139_s3 }
  0x28   :  { %p2146_p4 = por %p2145_p3, %p2144_p2 }
  0x2a   :  { %p2147_p5 = pnand %p2146_p4, %p2140_p1 }
  0x2c   :  { %2150 = shalt.err (!%p2147_p5)
}
  0x2d   :  { %78 = dma.hbm_to_vmem [thread:$0]  %s2621_s9, 1024, %s73_s5, [#allocation8], %s2158_s20, %s2158_s20, %s2159_s21  }
  0x2e   :  { %2151 = dma.done.wait [#allocation3], 4096  }
  0x2f   :  { %2152 = vsyncadd [#allocation3], 4294963200 }
  0x30   :  { %2153 = dma.done.wait [#allocation5], 3072  }
  0x31   :  { %2154 = vsyncadd [#allocation5], 4294964224 }
  0x32   :  { %2155 = dma.done.wait [#allocation8], 1024  }
  0x33   :  { %2156 = vsyncadd [#allocation8], 4294966272  ;;  %v1832_v0 = vld [vmem:[%s2613_s1 + $0x74] ss:$8 sps:$4 sm:$0xff]   ;;  %v1834_v1 = vld [vmem:[%s2613_s1 + $0x70] ss:$8 sps:$4 sm:$0xff]  }
  0x34   :  { %712 = vmatprep.subr.bf16.mxu0 %v1832_v0  ;;  %v1835_v2 = vld [vmem:[%s2613_s1 + $0x174] ss:$8 sps:$4 sm:$0xff]   ;;  %v1837_v3 = vld [vmem:[%s2613_s1 + $0x170] ss:$8 sps:$4 sm:$0xff]   ;;  %v1838_v4 = vld [vmem:[%s2613_s1 + $0x64] ss:$8 sps:$4 sm:$0xff]  }
  0x35   :  { %713 = vmatpush1.bf16.msra.mxu0 %v1834_v1  ;;  %v1840_v5 = vld [vmem:[%s2613_s1 + $0x60] ss:$8 sps:$4 sm:$0xff]   ;;  %753 = vmatprep.subr.bf16.mxu1 %v1835_v2  ;;  %v1841_v6 = vld [vmem:[%s2613_s1 + $0x164] ss:$8 sps:$4 sm:$0xff]   ;;  %v1844_v8 = vld [vmem:[%s2613_s1 + $0x54] ss:$8 sps:$4 sm:$0xff]  }
  0x36   :  { %754 = vmatpush1.bf16.msra.mxu1 %v1837_v3  ;;  %714 = vmatprep.subr.bf16.mxu0 %v1838_v4  ;;  %v1843_v7 = vld [vmem:[%s2613_s1 + $0x160] ss:$8 sps:$4 sm:$0xff]   ;;  %v1846_v9 = vld [vmem:[%s2613_s1 + $0x50] ss:$8 sps:$4 sm:$0xff]   ;;  %v1847_v10 = vld [vmem:[%s2613_s1 + $0x154] ss:$8 sps:$4 sm:$0xff]  }
  0x37   :  { %755 = vmatprep.subr.bf16.mxu1 %v1841_v6  ;;  %v1850_v11 = vld [vmem:[%s2613_s1 + $0x44] ss:$8 sps:$4 sm:$0xff]   ;;  %v1849_v12 = vld [vmem:[%s2613_s1 + $0x150] ss:$8 sps:$4 sm:$0xff]   ;;  %v1852_v14 = vld [vmem:[%s2613_s1 + $0x40] ss:$8 sps:$4 sm:$0xff]  }
  0x38   :  { %v1853_v13 = vld [vmem:[%s2613_s1 + $0x144] ss:$8 sps:$4 sm:$0xff]   ;;  %v1856_v15 = vld [vmem:[%s2613_s1 + $0x34] ss:$8 sps:$4 sm:$0xff]   ;;  %v1855_v16 = vld [vmem:[%s2613_s1 + $0x140] ss:$8 sps:$4 sm:$0xff]  }
  0x39   :  { %715 = vmatpush1.bf16.msra.mxu0 %v1840_v5  ;;  %v1859_v17 = vld [vmem:[%s2613_s1 + $0x134] ss:$8 sps:$4 sm:$0xff]   ;;  %v1858_v18 = vld [vmem:[%s2613_s1 + $0x30] ss:$8 sps:$4 sm:$0xff]   ;;  %v1862_v19 = vld [vmem:[%s2613_s1 + $0x24] ss:$8 sps:$4 sm:$0xff]  }
  0x3a   :  { %716 = vmatprep.subr.bf16.mxu0 %v1844_v8  ;;  %756 = vmatpush1.bf16.msra.mxu1 %v1843_v7  ;;  %v1861_v20 = vld [vmem:[%s2613_s1 + $0x130] ss:$8 sps:$4 sm:$0xff]   ;;  %v1865_v21 = vld [vmem:[%s2613_s1 + $0x124] ss:$8 sps:$4 sm:$0xff]   ;;  %v1864_v22 = vld [vmem:[%s2613_s1 + $0x20] ss:$8 sps:$4 sm:$0xff]  }
  0x3b   :  { %757 = vmatprep.subr.bf16.mxu1 %v1847_v10  ;;  %v1868_v23 = vld [vmem:[%s2613_s1 + $0x14] ss:$8 sps:$4 sm:$0xff]   ;;  %v1867_v24 = vld [vmem:[%s2613_s1 + $0x120] ss:$8 sps:$4 sm:$0xff]   ;;  %v1870_v26 = vld [vmem:[%s2613_s1 + $0x10] ss:$8 sps:$4 sm:$0xff]  }
  0x3c   :  { %v1871_v25 = vld [vmem:[%s2613_s1 + $0x114] ss:$8 sps:$4 sm:$0xff]   ;;  %v1874_v27 = vld [vmem:[%s2613_s1 + $0x4] ss:$8 sps:$4 sm:$0xff]   ;;  %v1873_v28 = vld [vmem:[%s2613_s1 + $0x110] ss:$8 sps:$4 sm:$0xff]  }
  0x3d   :  { %717 = vmatpush1.bf16.msra.mxu0 %v1846_v9  ;;  %v1877_v29 = vld [vmem:[%s2613_s1 + $0x104] ss:$8 sps:$4 sm:$0xff]   ;;  %v1876_v30 = vld [vmem:[%s2613_s1] ss:$8 sps:$4 sm:$0xff]   ;;  %v1880_v31 = vld [vmem:[%s2613_s1 + $0xf4] ss:$8 sps:$4 sm:$0xff]  }
  0x3e   :  { %718 = vmatprep.subr.bf16.mxu0 %v1850_v11  ;;  %758 = vmatpush1.bf16.msra.mxu1 %v1849_v12  ;;  %v1879_v32 = vld [vmem:[%s2613_s1 + $0x100] ss:$8 sps:$4 sm:$0xff]   ;;  %v1883_v33 = vld [vmem:[%s2613_s1 + $0x1f4] ss:$8 sps:$4 sm:$0xff]   ;;  %v1882_v34 = vld [vmem:[%s2613_s1 + $0xf0] ss:$8 sps:$4 sm:$0xff]  }
  0x3f   :  { %759 = vmatprep.subr.bf16.mxu1 %v1853_v13  ;;  %v1886_v35 = vld [vmem:[%s2613_s1 + $0xe4] ss:$8 sps:$4 sm:$0xff]   ;;  %v1885_v36 = vld [vmem:[%s2613_s1 + $0x1f0] ss:$8 sps:$4 sm:$0xff]   ;;  %v1888_v38 = vld [vmem:[%s2613_s1 + $0xe0] ss:$8 sps:$4 sm:$0xff]  }
  0x40   :  { %v1889_v37 = vld [vmem:[%s2613_s1 + $0x1e4] ss:$8 sps:$4 sm:$0xff]   ;;  %v1892_v39 = vld [vmem:[%s2613_s1 + $0xd4] ss:$8 sps:$4 sm:$0xff]   ;;  %v1891_v40 = vld [vmem:[%s2613_s1 + $0x1e0] ss:$8 sps:$4 sm:$0xff]  }
  0x41   :  { %719 = vmatpush1.bf16.msra.mxu0 %v1852_v14  ;;  %v1895_v41 = vld [vmem:[%s2613_s1 + $0x1d4] ss:$8 sps:$4 sm:$0xff]   ;;  %v1894_v42 = vld [vmem:[%s2613_s1 + $0xd0] ss:$8 sps:$4 sm:$0xff]   ;;  %v1898_v43 = vld [vmem:[%s2613_s1 + $0xc4] ss:$8 sps:$4 sm:$0xff]  }
  0x42   :  { %720 = vmatprep.subr.bf16.mxu0 %v1856_v15  ;;  %760 = vmatpush1.bf16.msra.mxu1 %v1855_v16  ;;  %v1897_v44 = vld [vmem:[%s2613_s1 + $0x1d0] ss:$8 sps:$4 sm:$0xff]   ;;  %v1901_v45 = vld [vmem:[%s2613_s1 + $0x1c4] ss:$8 sps:$4 sm:$0xff]   ;;  %v1900_v47 = vld [vmem:[%s2613_s1 + $0xc0] ss:$8 sps:$4 sm:$0xff]  }
  0x43   :  { %761 = vmatprep.subr.bf16.mxu1 %v1859_v17  ;;  %v95_v46 = vld [vmem:[%s2612_s0 + $0x8] sm:$0xff]  ;;  %v1904_v49 = vld [vmem:[%s2613_s1 + $0xb4] ss:$8 sps:$4 sm:$0xff]   ;;  %v1906_v54 = vld [vmem:[%s2613_s1 + $0xb0] ss:$8 sps:$4 sm:$0xff]   ;;  %vm708_vm0 = vcmask 130048  }
  0x44   :  { %v102_v48 = vpack.c.bf16 %v95_v46, %v95_v46  ;;  %v97_v50 = vld [vmem:[%s2612_s0 + $0x18] sm:$0xff]  ;;  %v1903_v51 = vld [vmem:[%s2613_s1 + $0x1c0] ss:$8 sps:$4 sm:$0xff]   ;;  %v1910_v55 = vld [vmem:[%s2613_s1 + $0xa4] ss:$8 sps:$4 sm:$0xff]   ;;  %vm2167_vm5 = vmmov 0  }
  0x45   :  { %721 = vmatpush1.bf16.msra.mxu0 %v1858_v18  ;;  %v104_v52 = vpack.c.bf16 %v97_v50, %v97_v50  ;;  %v1907_v53 = vld [vmem:[%s2613_s1 + $0x1b4] ss:$8 sps:$4 sm:$0xff]   ;;  %v1909_v56 = vld [vmem:[%s2613_s1 + $0x1b0] ss:$8 sps:$4 sm:$0xff]   ;;  %v1913_v57 = vld [vmem:[%s2613_s1 + $0x1a4] ss:$8 sps:$4 sm:$0xff]  }
  0x46   :  { %722 = vmatprep.subr.bf16.mxu0 %v1862_v19  ;;  %762 = vmatpush1.bf16.msra.mxu1 %v1861_v20  ;;  %v1912_v58 = vld [vmem:[%s2613_s1 + $0xa0] ss:$8 sps:$4 sm:$0xff]   ;;  %v1916_v59 = vld [vmem:[%s2613_s1 + $0x94] ss:$8 sps:$4 sm:$0xff]   ;;  %v1918_v62 = vld [vmem:[%s2613_s1 + $0x90] ss:$8 sps:$4 sm:$0xff]  }
  0x47   :  { %763 = vmatprep.subr.bf16.mxu1 %v1865_v21  ;;  %744 = vmatprep.mubr.bf16.mxu0 %v102_v48  ;;  %v1915_v60 = vld [vmem:[%s2613_s1 + $0x1a0] ss:$8 sps:$4 sm:$0xff]   ;;  %v1919_v61 = vld [vmem:[%s2613_s1 + $0x194] ss:$8 sps:$4 sm:$0xff]   ;;  %v1922_v63 = vld [vmem:[%s2613_s1 + $0x84] ss:$8 sps:$4 sm:$0xff]  }
  0x48   :  { %785 = vmatprep.mubr.bf16.mxu1 %v104_v52  ;;  %v1921_v0 = vld [vmem:[%s2613_s1 + $0x190] ss:$8 sps:$4 sm:$0xff]   ;;  %v1924_v1 = vld [vmem:[%s2613_s1 + $0x80] ss:$8 sps:$4 sm:$0xff]   ;;  %v1925_v2 = vld [vmem:[%s2613_s1 + $0x184] ss:$8 sps:$4 sm:$0xff]  }
  0x49   :  { %723 = vmatpush1.bf16.msra.mxu0 %v1864_v22  ;;  %v1927_v3 = vld [vmem:[%s2613_s1 + $0x180] ss:$8 sps:$4 sm:$0xff]   ;;  %v1930_v5 = vld [vmem:[%s2613_s1 + $0x274] ss:$8 sps:$4 sm:$0xff]   ;;  %v1928_v8 = vld [vmem:[%s2613_s1 + $0x270] ss:$8 sps:$4 sm:$0xff]  }
  0x4a   :  { %724 = vmatprep.subr.bf16.mxu0 %v1868_v23  ;;  %764 = vmatpush1.bf16.msra.mxu1 %v1867_v24  ;;  %v94_v4 = vld [vmem:[%s2612_s0] sm:$0xff]  ;;  %v96_v6 = vld [vmem:[%s2612_s0 + $0x10] sm:$0xff]  ;;  %v99_v16 = vld [vmem:[%s2612_s0 + $0x28] sm:$0xff]  ;;  %v2165_v19 = vmov 0  }
  0x4b   :  { %765 = vmatprep.subr.bf16.mxu1 %v1871_v25  ;;  %v101_v7 = vpack.c.bf16 %v94_v4, %v94_v4  ;;  %v1933_v9 = vld [vmem:[%s2613_s1 + $0x264] ss:$8 sps:$4 sm:$0xff]   ;;  %v103_v10 = vpack.c.bf16 %v96_v6, %v96_v6  ;;  %v1973_v11 = vld [vmem:[%s2613_s1 + $0x300] ss:$8 sps:$4 sm:$0xff]   ;;  %v1936_v14 = vld [vmem:[%s2613_s1 + $0x254] ss:$8 sps:$4 sm:$0xff]   ;;  %v106_v17 = vpack.c.bf16 %v99_v16, %v99_v16 }
  0x4c   :  { %v1975_v12 = vld [vmem:[%s2613_s1 + $0x304] ss:$8 sps:$4 sm:$0xff]   ;;  %v1931_v13 = vld [vmem:[%s2613_s1 + $0x260] ss:$8 sps:$4 sm:$0xff]   ;;  %v100_v15 = vld [vmem:[%s2612_s0 + $0x30] sm:$0xff] }
  0x4d   :  { %725 = vmatpush1.bf16.msra.mxu0 %v1870_v26  ;;  %v1934_v18 = vld [vmem:[%s2613_s1 + $0x250] ss:$8 sps:$4 sm:$0xff]   ;;  %v1939_v20 = vld [vmem:[%s2613_s1 + $0x244] ss:$8 sps:$4 sm:$0xff]   ;;  %v107_v21 = vpack.c.bf16 %v100_v15, %v100_v15  ;;  %v1937_v22 = vld [vmem:[%s2613_s1 + $0x240] ss:$8 sps:$4 sm:$0xff]  }
  0x4e   :  { %726 = vmatprep.subr.bf16.mxu0 %v1874_v27  ;;  %766 = vmatpush1.bf16.msra.mxu1 %v1873_v28  ;;  %v1942_v23 = vld [vmem:[%s2613_s1 + $0x234] ss:$8 sps:$4 sm:$0xff]   ;;  %v1940_v24 = vld [vmem:[%s2613_s1 + $0x230] ss:$8 sps:$4 sm:$0xff]   ;;  %v1945_v25 = vld [vmem:[%s2613_s1 + $0x224] ss:$8 sps:$4 sm:$0xff]  }
  0x4f   :  { %767 = vmatprep.subr.bf16.mxu1 %v1877_v29  ;;  %v1943_v26 = vld [vmem:[%s2613_s1 + $0x220] ss:$8 sps:$4 sm:$0xff]   ;;  %v1948_v27 = vld [vmem:[%s2613_s1 + $0x214] ss:$8 sps:$4 sm:$0xff]   ;;  %v1946_v28 = vld [vmem:[%s2613_s1 + $0x210] ss:$8 sps:$4 sm:$0xff]  }
  0x50   :  { %v1951_v29 = vld [vmem:[%s2613_s1 + $0x204] ss:$8 sps:$4 sm:$0xff]   ;;  %v1976_v46 = vld [vmem:[%s2613_s1 + $0x280] ss:$8 sps:$4 sm:$0xff]   ;;  %v1981_v50 = vld [vmem:[#allocation2 + $0x74] ss:$8 sps:$4 sm:$0xff]  }
  0x51   :  { %727 = vmatpush1.bf16.msra.mxu0 %v1876_v30  ;;  %v1949_v30 = vld [vmem:[%s2613_s1 + $0x200] ss:$8 sps:$4 sm:$0xff]   ;;  %v2009_v6 = vld [vmem:[#allocation2 + $0xd0] ss:$8 sps:$4 sm:$0xff]   ;;  %v2026_v15 = vld [vmem:[#allocation2 + $0x84] ss:$8 sps:$4 sm:$0xff]  }
  0x52   :  { %728 = vmatprep.subr.bf16.mxu0 %v1880_v31  ;;  %768 = vmatpush1.bf16.msra.mxu1 %v1879_v32  ;;  %v1954_v31 = vld [vmem:[%s2613_s1 + $0x2f4] ss:$8 sps:$4 sm:$0xff]   ;;  %v1952_v32 = vld [vmem:[%s2613_s1 + $0x2f0] ss:$8 sps:$4 sm:$0xff]   ;;  %v1982_v52 = vld [vmem:[#allocation2 + $0x60] ss:$8 sps:$4 sm:$0xff]  }
  0x53   :  { %769 = vmatprep.subr.bf16.mxu1 %v1883_v33  ;;  %v1957_v33 = vld [vmem:[%s2613_s1 + $0x2e4] ss:$8 sps:$4 sm:$0xff]   ;;  %v2006_v4 = vld [vmem:[#allocation2 + $0xe0] ss:$8 sps:$4 sm:$0xff]  }
  0x54   :  { %v2024_v16 = vld [vmem:[#allocation2 + $0x80] ss:$8 sps:$4 sm:$0xff]  }
  0x55   :  { %729 = vmatpush2.bf16.msra.mxu0 %v1882_v34  ;;  %v1955_v34 = vld [vmem:[%s2613_s1 + $0x2e0] ss:$8 sps:$4 sm:$0xff]  }
  0x56   :  { %730 = vmatprep.subr.bf16.mxu0 %v1886_v35  ;;  %770 = vmatpush2.bf16.msra.mxu1 %v1885_v36  ;;  %v1960_v35 = vld [vmem:[%s2613_s1 + $0x2d4] ss:$8 sps:$4 sm:$0xff]   ;;  %v1958_v36 = vld [vmem:[%s2613_s1 + $0x2d0] ss:$8 sps:$4 sm:$0xff]  }
  0x57   :  { %771 = vmatprep.subr.bf16.mxu1 %v1889_v37  ;;  %v1963_v37 = vld [vmem:[%s2613_s1 + $0x2c4] ss:$8 sps:$4 sm:$0xff]  }
  0x59   :  { %731 = vmatpush2.bf16.msra.mxu0 %v1888_v38  ;;  %v1961_v38 = vld [vmem:[%s2613_s1 + $0x2c0] ss:$8 sps:$4 sm:$0xff]  }
  0x5a   :  { %732 = vmatprep.subr.bf16.mxu0 %v1892_v39  ;;  %772 = vmatpush2.bf16.msra.mxu1 %v1891_v40  ;;  %v1966_v39 = vld [vmem:[%s2613_s1 + $0x2b4] ss:$8 sps:$4 sm:$0xff]   ;;  %v1964_v40 = vld [vmem:[%s2613_s1 + $0x2b0] ss:$8 sps:$4 sm:$0xff]  }
  0x5b   :  { %773 = vmatprep.subr.bf16.mxu1 %v1895_v41  ;;  %v1969_v41 = vld [vmem:[%s2613_s1 + $0x2a4] ss:$8 sps:$4 sm:$0xff]  }
  0x5d   :  { %733 = vmatpush2.bf16.msra.mxu0 %v1894_v42  ;;  %v1967_v42 = vld [vmem:[%s2613_s1 + $0x2a0] ss:$8 sps:$4 sm:$0xff]  }
  0x5e   :  { %734 = vmatprep.subr.bf16.mxu0 %v1898_v43  ;;  %774 = vmatpush2.bf16.msra.mxu1 %v1897_v44  ;;  %v1972_v43 = vld [vmem:[%s2613_s1 + $0x294] ss:$8 sps:$4 sm:$0xff]   ;;  %v1970_v44 = vld [vmem:[%s2613_s1 + $0x290] ss:$8 sps:$4 sm:$0xff]  }
  0x5f   :  { %775 = vmatprep.subr.bf16.mxu1 %v1901_v45  ;;  %v1978_v45 = vld [vmem:[%s2613_s1 + $0x284] ss:$8 sps:$4 sm:$0xff]  }
  0x61   :  { %735 = vmatpush2.bf16.msra.mxu0 %v1900_v47  ;;  %v98_v47 = vld [vmem:[%s2612_s0 + $0x20] sm:$0xff] }
  0x62   :  { %736 = vmatprep.subr.bf16.mxu0 %v1904_v49  ;;  %776 = vmatpush2.bf16.msra.mxu1 %v1903_v51  ;;  %v105_v48 = vpack.c.bf16 %v98_v47, %v98_v47  ;;  %v1979_v49 = vld [vmem:[#allocation2 + $0x70] ss:$8 sps:$4 sm:$0xff]   ;;  %v1984_v51 = vld [vmem:[#allocation2 + $0x64] ss:$8 sps:$4 sm:$0xff]  }
  0x63   :  { %777 = vmatprep.subr.bf16.mxu1 %v1907_v53  ;;  %v1987_v53 = vld [vmem:[#allocation2 + $0x54] ss:$8 sps:$4 sm:$0xff]  }
  0x65   :  { %737 = vmatpush2.bf16.msra.mxu0 %v1906_v54  ;;  %v1985_v54 = vld [vmem:[#allocation2 + $0x50] ss:$8 sps:$4 sm:$0xff]  }
  0x66   :  { %738 = vmatprep.subr.bf16.mxu0 %v1910_v55  ;;  %778 = vmatpush2.bf16.msra.mxu1 %v1909_v56  ;;  %v1990_v55 = vld [vmem:[#allocation2 + $0x44] ss:$8 sps:$4 sm:$0xff]   ;;  %v1988_v56 = vld [vmem:[#allocation2 + $0x40] ss:$8 sps:$4 sm:$0xff]  }
  0x67   :  { %779 = vmatprep.subr.bf16.mxu1 %v1913_v57  ;;  %v1993_v57 = vld [vmem:[#allocation2 + $0x34] ss:$8 sps:$4 sm:$0xff]  }
  0x69   :  { %739 = vmatpush2.bf16.msra.mxu0 %v1912_v58  ;;  %v1991_v58 = vld [vmem:[#allocation2 + $0x30] ss:$8 sps:$4 sm:$0xff]  }
  0x6a   :  { %740 = vmatprep.subr.bf16.mxu0 %v1916_v59  ;;  %780 = vmatpush2.bf16.msra.mxu1 %v1915_v60  ;;  %v1996_v59 = vld [vmem:[#allocation2 + $0x24] ss:$8 sps:$4 sm:$0xff]   ;;  %v1994_v60 = vld [vmem:[#allocation2 + $0x20] ss:$8 sps:$4 sm:$0xff]  }
  0x6b   :  { %781 = vmatprep.subr.bf16.mxu1 %v1919_v61  ;;  %v1999_v61 = vld [vmem:[#allocation2 + $0x14] ss:$8 sps:$4 sm:$0xff]  }
  0x6d   :  { %741 = vmatpush2.bf16.msra.mxu0 %v1918_v62  ;;  %v1997_v62 = vld [vmem:[#allocation2 + $0x10] ss:$8 sps:$4 sm:$0xff]  }
  0x6e   :  { %742 = vmatprep.subr.bf16.mxu0 %v1922_v63  ;;  %782 = vmatpush2.bf16.msra.mxu1 %v1921_v0  ;;  %v2002_v63 = vld [vmem:[#allocation2 + $0x4] ss:$8 sps:$4 sm:$0xff]   ;;  %v2000_v0 = vld [vmem:[#allocation2] ss:$8 sps:$4 sm:$0xff]  }
  0x6f   :  { %783 = vmatprep.subr.bf16.mxu1 %v1925_v2  ;;  %v2003_v2 = vld [vmem:[#allocation2 + $0xf0] ss:$8 sps:$4 sm:$0xff]  }
  0x71   :  { %743 = vmatpush2.bf16.msra.mxu0 %v1924_v1  ;;  %v2005_v1 = vld [vmem:[#allocation2 + $0xf4] ss:$8 sps:$4 sm:$0xff]  }
  0x72   :  { %794 = vmatprep.subr.bf16.mxu0 %v1930_v5  ;;  %784 = vmatpush2.bf16.msra.mxu1 %v1927_v3  ;;  %v2008_v3 = vld [vmem:[#allocation2 + $0xe4] ss:$8 sps:$4 sm:$0xff]   ;;  %v2011_v5 = vld [vmem:[#allocation2 + $0xd4] ss:$8 sps:$4 sm:$0xff]  }
  0x73   :  { %849 = vmatprep.subr.bf16.mxu1 %v1975_v12  ;;  %v2018_v12 = vld [vmem:[#allocation2 + $0xa0] ss:$8 sps:$4 sm:$0xff]  }
  0x74   :  { %745 = vmatmul.mubr.bf16.vlgmr.msra.gmra.mxu0 %v101_v7  ;;  %v2014_v7 = vld [vmem:[#allocation2 + $0xc4] ss:$8 sps:$4 sm:$0xff]  }
  0x75   :  { %795 = vmatpush1.bf16.msra.mxu0 %v1928_v8  ;;  %786 = vmatmul.mubr.bf16.vlgmr.msra.gmra.mxu1 %v103_v10  ;;  %v2012_v8 = vld [vmem:[#allocation2 + $0xc0] ss:$8 sps:$4 sm:$0xff]   ;;  %v2015_v10 = vld [vmem:[#allocation2 + $0xb0] ss:$8 sps:$4 sm:$0xff]  }
  0x76   :  { %796 = vmatprep.subr.bf16.mxu0 %v1933_v9  ;;  %850 = vmatpush1.bf16.msra.mxu1 %v1973_v11  ;;  %v2017_v9 = vld [vmem:[#allocation2 + $0xb4] ss:$8 sps:$4 sm:$0xff]   ;;  %v2020_v11 = vld [vmem:[#allocation2 + $0xa4] ss:$8 sps:$4 sm:$0xff]  }
  0x77   :  { %867 = vmatprep.mubr.bf16.mxu1 %v2165_v19  ;;  %826 = vmatprep.mubr.bf16.mxu0 %v106_v17  ;;  %v2027_v17 = vld [vmem:[#allocation4 + $0x78] sm:$0xff]  }
  0x78   :  { %1094 = vmatprep.subr.bf16.mxu1 %v1981_v50 }
  0x79   :  { %797 = vmatpush1.bf16.msra.mxu0 %v1931_v13  ;;  %v2023_v13 = vld [vmem:[#allocation2 + $0x94] ss:$8 sps:$4 sm:$0xff]  }
  0x7a   :  { %798 = vmatprep.subr.bf16.mxu0 %v1936_v14  ;;  %v2021_v14 = vld [vmem:[#allocation2 + $0x90] ss:$8 sps:$4 sm:$0xff]  }
  0x7d   :  { %799 = vmatpush1.bf16.msra.mxu0 %v1934_v18  ;;  %1667 = vmatmul.mubr.msk.bf16.vlgmr.msra.gmra.mxu1 %vm708_vm0, %v107_v21  ;;  %v2028_v18 = vld [vmem:[#allocation4 + $0x38] sm:$0xff]  }
  0x7e   :  { %800 = vmatprep.subr.bf16.mxu0 %v1939_v20  ;;  %1095 = vmatpush1.bf16.msra.mxu1 %v1979_v49 }
  0x7f   :  { %1096 = vmatprep.subr.bf16.mxu1 %v1984_v51 }
  0x81   :  { %801 = vmatpush1.bf16.msra.mxu0 %v1937_v22 }
  0x82   :  { %802 = vmatprep.subr.bf16.mxu0 %v1942_v23  ;;  %1097 = vmatpush1.bf16.msra.mxu1 %v1982_v52 }
  0x83   :  { %1098 = vmatprep.subr.bf16.mxu1 %v1987_v53 }
  0x85   :  { %803 = vmatpush1.bf16.msra.mxu0 %v1940_v24 }
  0x86   :  { %804 = vmatprep.subr.bf16.mxu0 %v1945_v25  ;;  %1099 = vmatpush1.bf16.msra.mxu1 %v1985_v54 }
  0x87   :  { %1100 = vmatprep.subr.bf16.mxu1 %v1990_v55 }
  0x89   :  { %805 = vmatpush1.bf16.msra.mxu0 %v1943_v26 }
  0x8a   :  { %806 = vmatprep.subr.bf16.mxu0 %v1948_v27  ;;  %1101 = vmatpush1.bf16.msra.mxu1 %v1988_v56 }
  0x8b   :  { %1102 = vmatprep.subr.bf16.mxu1 %v1993_v57 }
  0x8d   :  { %807 = vmatpush1.bf16.msra.mxu0 %v1946_v28 }
  0x8e   :  { %808 = vmatprep.subr.bf16.mxu0 %v1951_v29  ;;  %1103 = vmatpush1.bf16.msra.mxu1 %v1991_v58 }
  0x8f   :  { %1104 = vmatprep.subr.bf16.mxu1 %v1996_v59 }
  0x91   :  { %809 = vmatpush1.bf16.msra.mxu0 %v1949_v30 }
  0x92   :  { %810 = vmatprep.subr.bf16.mxu0 %v1954_v31  ;;  %1105 = vmatpush1.bf16.msra.mxu1 %v1994_v60  ;;  %v208_v31 = vlaneseq }
  0x93   :  { %1106 = vmatprep.subr.bf16.mxu1 %v1999_v61 }
  0x95   :  { %811 = vmatpush2.bf16.msra.mxu0 %v1952_v32  ;;  %v2564_v32 = vshrl.u32 %v208_v31, 7 }
  0x96   :  { %812 = vmatprep.subr.bf16.mxu0 %v1957_v33  ;;  %1107 = vmatpush1.bf16.msra.mxu1 %v1997_v62  ;;  %v2029_v62 = vld [vmem:[#allocation4 + $0x70] sm:$0xff]  }
  0x97   :  { %1108 = vmatprep.subr.bf16.mxu1 %v2002_v63  ;;  %v210_v33 = vsub.s32 0, %v2564_v32  ;;  %v2030_v63 = vld [vmem:[#allocation4 + $0x30] sm:$0xff]  }
  0x99   :  { %813 = vmatpush2.bf16.msra.mxu0 %v1955_v34  ;;  %v206_v34 = vld [vmem:[%s2614_s2] sm:$0x3] }
  0x9a   :  { %814 = vmatprep.subr.bf16.mxu0 %v1960_v35  ;;  %1109 = vmatpush1.bf16.msra.mxu1 %v2000_v0  ;;  %v214_v35 = vsub.s32 1, %v2564_v32  ;;  %v2031_v0 = vld [vmem:[#allocation4 + $0x68] sm:$0xff]  }
  0x9b   :  { %1110 = vmatprep.subr.bf16.mxu1 %v2005_v1  ;;  %v2032_v1 = vld [vmem:[#allocation4 + $0x28] sm:$0xff]  }
  0x9d   :  { %815 = vmatpush2.bf16.msra.mxu0 %v1958_v36  ;;  %v211_v36 = vrot.slane %v206_v34, %v210_v33 }
  0x9e   :  { %816 = vmatprep.subr.bf16.mxu0 %v1963_v37  ;;  %1111 = vmatpush2.bf16.msra.mxu1 %v2003_v2  ;;  %v215_v37 = vrot.slane %v206_v34, %v214_v35  ;;  %v2033_v2 = vld [vmem:[#allocation4 + $0x60] sm:$0xff]  }
  0x9f   :  { %1112 = vmatprep.subr.bf16.mxu1 %v2008_v3  ;;  %v2034_v3 = vld [vmem:[#allocation4 + $0x20] sm:$0xff]  }
  0xa1   :  { %817 = vmatpush2.bf16.msra.mxu0 %v1961_v38 }
  0xa2   :  { %818 = vmatprep.subr.bf16.mxu0 %v1966_v39  ;;  %1113 = vmatpush2.bf16.msra.mxu1 %v2006_v4  ;;  %v2035_v4 = vld [vmem:[#allocation4 + $0x58] sm:$0xff]  }
  0xa3   :  { %1114 = vmatprep.subr.bf16.mxu1 %v2011_v5  ;;  %v2036_v5 = vld [vmem:[#allocation4 + $0x18] sm:$0xff]  }
  0xa5   :  { %819 = vmatpush2.bf16.msra.mxu0 %v1964_v40 }
  0xa6   :  { %820 = vmatprep.subr.bf16.mxu0 %v1969_v41  ;;  %1115 = vmatpush2.bf16.msra.mxu1 %v2009_v6  ;;  %v2037_v6 = vld [vmem:[#allocation4 + $0x50] sm:$0xff]  }
  0xa7   :  { %1116 = vmatprep.subr.bf16.mxu1 %v2014_v7  ;;  %v2038_v7 = vld [vmem:[#allocation4 + $0x10] sm:$0xff]  }
  0xa9   :  { %821 = vmatpush2.bf16.msra.mxu0 %v1967_v42 }
  0xaa   :  { %822 = vmatprep.subr.bf16.mxu0 %v1972_v43  ;;  %1117 = vmatpush2.bf16.msra.mxu1 %v2012_v8  ;;  %v2039_v8 = vld [vmem:[#allocation4 + $0x48] sm:$0xff]  }
  0xab   :  { %1118 = vmatprep.subr.bf16.mxu1 %v2017_v9  ;;  %v2040_v9 = vld [vmem:[#allocation4 + $0x8] sm:$0xff]  }
  0xad   :  { %823 = vmatpush2.bf16.msra.mxu0 %v1970_v44 }
  0xae   :  { %824 = vmatprep.subr.bf16.mxu0 %v1978_v45  ;;  %1119 = vmatpush2.bf16.msra.mxu1 %v2015_v10  ;;  %v2041_v10 = vld [vmem:[#allocation4 + $0x40] sm:$0xff]  }
  0xaf   :  { %1120 = vmatprep.subr.bf16.mxu1 %v2020_v11  ;;  %v2042_v11 = vld [vmem:[#allocation4] sm:$0xff]  }
  0xb1   :  { %825 = vmatpush2.bf16.msra.mxu0 %v1976_v46 }
  0xb2   :  { %1121 = vmatpush2.bf16.msra.mxu1 %v2018_v12  ;;  %1741 = vmatprep.subr.bf16.mxu0 %v2027_v17  ;;  %v2043_v12 = vld [vmem:[#allocation6 + $0x38] sm:$0xff]  }
  0xb3   :  { %1122 = vmatprep.subr.bf16.mxu1 %v2023_v13  ;;  %v2166_v13 = vmov 0.0  }
  0xb4   :  { %827 = vmatmul.mubr.bf16.vlgmr.msra.gmra.mxu0 %v105_v48 }
  0xb5   :  { %1742 = vmatpush3.bf16.msra.mxu0 %v2028_v18 }
  0xb6   :  { %1123 = vmatpush2.bf16.msra.mxu1 %v2021_v14  ;;  %1743 = vmatprep.subr.bf16.mxu0 %v2029_v62  ;;  %v922_v14 = vld [vmem:[%s2616_s4] sm:$0x3] }
  0xb7   :  { %1124 = vmatprep.subr.bf16.mxu1 %v2026_v15  ;;  %v927_v15 = vrot.slane %v922_v14, %v210_v33  ;;  %v2058_v62 = vld [vmem:[#allocation7] sm:$0xff]  }
  0xb9   :  { %1744 = vmatpush3.bf16.msra.mxu0 %v2030_v63  ;;  %v1722_v63 = vld [vmem:[%s2620_s8] ss:$0 sm:$0xff] }
  0xba   :  { %1125 = vmatpush2.bf16.msra.mxu1 %v2024_v16  ;;  %1745 = vmatprep.subr.bf16.mxu0 %v2031_v0  ;;  %v931_v16 = vrot.slane %v922_v14, %v214_v35  ;;  %v2044_v35 = vld [vmem:[#allocation6 + $0x30] sm:$0xff]  }
  0xbb   :  { %1781 = vmatprep.subr.bf16.mxu1 %v2166_v13 }
  0xbd   :  { %1746 = vmatpush3.bf16.msra.mxu0 %v2032_v1 }
  0xbe   :  { %1747 = vmatprep.subr.bf16.mxu0 %v2033_v2 }
  0xc1   :  { %1748 = vmatpush3.bf16.msra.mxu0 %v2034_v3 }
  0xc2   :  { %1749 = vmatprep.subr.bf16.mxu0 %v2035_v4 }
  0xc5   :  { %1750 = vmatpush3.bf16.msra.mxu0 %v2036_v5 }
  0xc6   :  { %1751 = vmatprep.subr.bf16.mxu0 %v2037_v6 }
  0xc9   :  { %1752 = vmatpush3.bf16.msra.mxu0 %v2038_v7 }
  0xca   :  { %1753 = vmatprep.subr.bf16.mxu0 %v2039_v8 }
  0xcd   :  { %1754 = vmatpush3.bf16.msra.mxu0 %v2040_v9 }
  0xce   :  { %1755 = vmatprep.subr.bf16.mxu0 %v2041_v10 }
  0xd1   :  { %1756 = vmatpush3.bf16.msra.mxu0 %v2042_v11  ;;  %v1732_v11 = vld [vmem:[%s2622_s10] ss:$0 sm:$0xff] }
  0xd2   :  { %1801 = vmatprep.subr.bf16.mxu0 %v2166_v13 }
 0x134   :  { %v746_v19 = vpop.f32.mrf.mxu0 }
 0x135   :  { %v787_v21 = vpop.f32.mrf.mxu1  ;;  %v747_v38 = vadd.f32 %v746_v19, %v211_v36  ;;  %v2045_v36 = vld [vmem:[#allocation6 + $0x28] sm:$0xff]  }
 0x136   :  { %v748_v20 = vpop.f32.mrf.mxu0 }
 0x137   :  { %v789_v23 = vpop.f32.mrf.mxu1  ;;  %v749_v39 = vadd.f32 %v748_v20, %v215_v37  ;;  %v788_v40 = vadd.f32 %v787_v21, %v747_v38  ;;  %v2046_v37 = vld [vmem:[#allocation6 + $0x20] sm:$0xff]   ;;  %v2047_v38 = vld [vmem:[#allocation6 + $0x18] sm:$0xff]  }
 0x138   :  { %v750_v22 = vpop.f32.mrf.mxu0 }
 0x139   :  { %v791_v25 = vpop.f32.mrf.mxu1  ;;  %v790_v42 = vadd.f32 %v789_v23, %v749_v39  ;;  %v2048_v39 = vld [vmem:[#allocation6 + $0x10] sm:$0xff]  }
 0x13a   :  { %v751_v24 = vpop.f32.mrf.mxu0 }
 0x13b   :  { %v792_v26 = vpop.f32.mrf.mxu1 }
 0x13d   :  { %v869_v27 = vpop.f32.mrf.mxu1 }
 0x13f   :  { %v871_v28 = vpop.f32.mrf.mxu1 }
 0x141   :  { %v873_v29 = vpop.f32.mrf.mxu1 }
 0x143   :  { %v874_v30 = vpop.f32.mrf.mxu1 }
 0x174   :  { %v828_v41 = vpop.f32.mrf.mxu0 }
 0x175   :  { %v829_v43 = vadd.f32 %v828_v41, %v788_v40  ;;  %v2049_v40 = vld [vmem:[#allocation6 + $0x8] sm:$0xff]   ;;  %v2050_v41 = vld [vmem:[#allocation6] sm:$0xff]  }
 0x176   :  { %v830_v44 = vpop.f32.mrf.mxu0 }
 0x177   :  { %v870_v45 = vadd.f32 %v869_v27, %v829_v43  ;;  %v831_v46 = vadd.f32 %v830_v44, %v790_v42  ;;  %v2051_v42 = vld [vmem:[#allocation7 + $0x38] sm:$0xff]   ;;  %v2052_v43 = vld [vmem:[#allocation7 + $0x30] sm:$0xff]  }
 0x178   :  { %v832_v47 = vpop.f32.mrf.mxu0 }
 0x179   :  { %v878_v48 = vmul.f32 1.442695, %v870_v45  ;;  %v872_v49 = vadd.f32 %v871_v28, %v831_v46  ;;  %vm876_vm1 = vcmp.gt.f32.partialorder %v870_v45, 0.0 }
 0x17a   :  { %v833_v50 = vpop.f32.mrf.mxu0 }
 0x17b   :  { %2059 = vpow2.f32 %v878_v48  ;;  %v880_v51 = vmul.f32 1.442695, %v872_v49  ;;  %vm877_vm2 = vcmp.gt.f32.partialorder %v872_v49, 0.0 }
 0x17d   :  { %2061 = vpow2.f32 %v880_v51 }
 0x188   :  { %v2060_v52 = vpop.eup %2059 }
 0x189   :  { %v1668_v53 = vadd.f32 -1.0, %v2060_v52 }
 0x18a   :  { %v2062_v54 = vpop.eup %2061 }
 0x18b   :  { %v884_v55 = vmul.f32 1.6732632, %v1668_v53  ;;  %v1669_v56 = vadd.f32 -1.0, %v2062_v54 }
 0x18d   :  { %v885_v57 = vmul.f32 1.6732632, %v1669_v56  ;;  %v886_v58 = vsel %vm876_vm1, %v870_v45, %v884_v55  ;;  %v1704_v45 = vld [vmem:[%s2618_s6] ss:$0 sm:$0xff] }
 0x18e   :  { %v888_v61 = vpack.c.bf16 %v886_v58, %v886_v58  ;;  %v2054_v58 = vld [vmem:[#allocation7 + $0x20] sm:$0xff]  }
 0x18f   :  { %v887_v59 = vsel %vm877_vm2, %v872_v49, %v885_v57  ;;  %v2053_v57 = vld [vmem:[#allocation7 + $0x28] sm:$0xff]  }
 0x190   :  { %v889_v60 = vpack.c.bf16 %v887_v59, %v887_v59  ;;  %v2055_v59 = vld [vmem:[#allocation7 + $0x18] sm:$0xff]  }
 0x192   :  { %1126 = vmatprep.mubr.bf16.mxu1 %v889_v60  ;;  %v2056_v60 = vld [vmem:[#allocation7 + $0x10] sm:$0xff]  }
 0x193   :  { %1127 = vmatmul.mubr.bf16.vlgmr.msra.gmra.mxu1 %v888_v61  ;;  %v2057_v61 = vld [vmem:[#allocation7 + $0x8] sm:$0xff]  }
 0x194   :  { %1782 = vmatpush3.bf16.msra.mxu1 %v2043_v12  ;;  %1797 = vmatprep.mubr.msk.bf16.mxu1 %vm2167_vm5, %v2166_v13 }
 0x195   :  { %1783 = vmatprep.subr.bf16.mxu1 %v2166_v13 }
 0x198   :  { %1784 = vmatpush3.bf16.msra.mxu1 %v2044_v35 }
 0x199   :  { %1785 = vmatprep.subr.bf16.mxu1 %v2166_v13 }
 0x19c   :  { %1786 = vmatpush3.bf16.msra.mxu1 %v2045_v36 }
 0x19d   :  { %1787 = vmatprep.subr.bf16.mxu1 %v2166_v13 }
 0x1a0   :  { %1788 = vmatpush3.bf16.msra.mxu1 %v2046_v37 }
 0x1a1   :  { %1789 = vmatprep.subr.bf16.mxu1 %v2166_v13 }
 0x1a4   :  { %1790 = vmatpush3.bf16.msra.mxu1 %v2047_v38 }
 0x1a5   :  { %1791 = vmatprep.subr.bf16.mxu1 %v2166_v13 }
 0x1a8   :  { %1792 = vmatpush3.bf16.msra.mxu1 %v2048_v39 }
 0x1a9   :  { %1793 = vmatprep.subr.bf16.mxu1 %v2166_v13 }
 0x1ac   :  { %1794 = vmatpush3.bf16.msra.mxu1 %v2049_v40 }
 0x1ad   :  { %1795 = vmatprep.subr.bf16.mxu1 %v2166_v13 }
 0x1b0   :  { %1796 = vmatpush3.bf16.msra.mxu1 %v2050_v41 }
 0x253   :  { %v1128_v17 = vpop.f32.mrf.mxu1 }
 0x254   :  { %v1129_v18 = vadd.f32 %v1128_v17, %v927_v15 }
 0x255   :  { %v1130_v19 = vpop.f32.mrf.mxu1 }
 0x256   :  { %v1137_v20 = vmul.f32 1.442695, %v1129_v18  ;;  %v1131_v21 = vadd.f32 %v1130_v19, %v931_v16  ;;  %vm1135_vm3 = vcmp.gt.f32.partialorder %v1129_v18, 0.0 }
 0x257   :  { %v1132_v22 = vpop.f32.mrf.mxu1 }
 0x258   :  { %2063 = vpow2.f32 %v1137_v20  ;;  %v1139_v23 = vmul.f32 1.442695, %v1131_v21  ;;  %vm1136_vm4 = vcmp.gt.f32.partialorder %v1131_v21, 0.0 }
 0x259   :  { %v1133_v24 = vpop.f32.mrf.mxu1 }
 0x25a   :  { %2065 = vpow2.f32 %v1139_v23 }
 0x265   :  { %v2064_v25 = vpop.eup %2063 }
 0x266   :  { %v1702_v26 = vadd.f32 -1.0, %v2064_v25 }
 0x267   :  { %v2066_v27 = vpop.eup %2065 }
 0x268   :  { %v1143_v28 = vmul.f32 1.6732632, %v1702_v26  ;;  %v1703_v29 = vadd.f32 -1.0, %v2066_v27 }
 0x26a   :  { %v1144_v30 = vmul.f32 1.6732632, %v1703_v29  ;;  %v1145_v31 = vsel %vm1135_vm3, %v1129_v18, %v1143_v28 }
 0x26b   :  { %v1147_v34 = vpack.c.bf16 %v1145_v31, %v1145_v31 }
 0x26c   :  { %v1146_v32 = vsel %vm1136_vm4, %v1131_v21, %v1144_v30 }
 0x26d   :  { %v1148_v33 = vpack.c.bf16 %v1146_v32, %v1146_v32 }
 0x26f   :  { %1316 = vmatprep.mubr.bf16.mxu0 %v1148_v33 }
 0x270   :  { %1317 = vmatmul.mubr.bf16.vlgmr.msra.gmra.mxu0 %v1147_v34 }
 0x271   :  { %1817 = vmatprep.mubr.msk.bf16.mxu0 %vm2167_vm5, %v2166_v13  ;;  %1802 = vmatpush3.bf16.msra.mxu0 %v2051_v42 }
 0x272   :  { %1803 = vmatprep.subr.bf16.mxu0 %v2166_v13 }
 0x275   :  { %1804 = vmatpush3.bf16.msra.mxu0 %v2052_v43 }
 0x276   :  { %1805 = vmatprep.subr.bf16.mxu0 %v2166_v13 }
 0x279   :  { %1806 = vmatpush3.bf16.msra.mxu0 %v2053_v57 }
 0x27a   :  { %1807 = vmatprep.subr.bf16.mxu0 %v2166_v13 }
 0x27d   :  { %1808 = vmatpush3.bf16.msra.mxu0 %v2054_v58 }
 0x27e   :  { %1809 = vmatprep.subr.bf16.mxu0 %v2166_v13 }
 0x281   :  { %1810 = vmatpush3.bf16.msra.mxu0 %v2055_v59 }
 0x282   :  { %1811 = vmatprep.subr.bf16.mxu0 %v2166_v13 }
 0x285   :  { %1812 = vmatpush3.bf16.msra.mxu0 %v2056_v60 }
 0x286   :  { %1813 = vmatprep.subr.bf16.mxu0 %v2166_v13 }
 0x289   :  { %1814 = vmatpush3.bf16.msra.mxu0 %v2057_v61 }
 0x28a   :  { %1815 = vmatprep.subr.bf16.mxu0 %v2166_v13 }
 0x28d   :  { %1816 = vmatpush3.bf16.msra.mxu0 %v2058_v62 }
 0x330   :  { %v1757_v44 = vpop.f32.mrf.mxu0 }
 0x332   :  { %v1758_v46 = vpop.f32.mrf.mxu0 }
 0x333   :  { %v1759_v47 = vadd.f32 %v1758_v46, %v1757_v44 }
 0x334   :  { %v1760_v48 = vpop.f32.mrf.mxu0 }
 0x335   :  { %v1319_v49 = vadd.f32 %v1759_v47, %v1704_v45 }
 0x336   :  { %v1761_v50 = vpop.f32.mrf.mxu0 }
 0x337   :  { %v1325_v51 = vmul.f32 1.442695, %v1319_v49  ;;  %vm1324_vm6 = vcmp.gt.f32.partialorder %v1319_v49, 0.0 }
 0x339   :  { %2067 = vpow2.f32 %v1325_v51 }
 0x346   :  { %v2068_v52 = vpop.eup %2067 }
 0x347   :  { %v1721_v53 = vadd.f32 -1.0, %v2068_v52 }
 0x349   :  { %v1328_v54 = vmul.f32 1.6732632, %v1721_v53 }
 0x34b   :  { %v1329_v55 = vsel %vm1324_vm6, %v1319_v49, %v1328_v54 }
 0x34c   :  { %v1330_v56 = vpack.c.bf16 %v1329_v55, %v1329_v55 }
 0x34e   :  { %1798 = vmatmul.mubr.bf16.vlgmr.msra.gmra.mxu1 %v1330_v56 }
 0x40e   :  { %v1436_v0 = vpop.f32.mrf.mxu1 }
 0x40f   :  { %v1437_v1 = vadd.f32 %v1722_v63, %v1436_v0 }
 0x410   :  { %v1799_v2 = vpop.f32.mrf.mxu1 }
 0x411   :  { %v1443_v3 = vmul.f32 1.442695, %v1437_v1  ;;  %vm1442_vm7 = vcmp.gt.f32.partialorder %v1437_v1, 0.0 }
 0x412   :  { %v1439_v4 = vpop.f32.mrf.mxu1 }
 0x413   :  { %2069 = vpow2.f32 %v1443_v3 }
 0x414   :  { %v1800_v5 = vpop.f32.mrf.mxu1 }
 0x420   :  { %v2070_v6 = vpop.eup %2069 }
 0x421   :  { %v1731_v7 = vadd.f32 -1.0, %v2070_v6 }
 0x423   :  { %v1446_v8 = vmul.f32 1.6732632, %v1731_v7 }
 0x425   :  { %v1447_v9 = vsel %vm1442_vm7, %v1437_v1, %v1446_v8 }
 0x426   :  { %v1448_v10 = vpack.c.bf16 %v1447_v9, %v1447_v9 }
 0x428   :  { %1818 = vmatmul.mubr.bf16.vlgmr.msra.gmra.mxu0 %v1448_v10 }
 0x4e8   :  { %v1554_v12 = vpop.f32.mrf.mxu0 }
 0x4e9   :  { %v1555_v13 = vadd.f32 %v1732_v11, %v1554_v12 }
 0x4ea   :  { %v1819_v14 = vpop.f32.mrf.mxu0 }
 0x4eb   :  { %v1560_v15 = vpack.c.bf16 %v1555_v13, %v1555_v13 }
 0x4ec   :  { %v1557_v16 = vpop.f32.mrf.mxu0 }
 0x4ed   :  { %1561 = vst [vmem:[%s2623_s11] sm:$0xf] %v1560_v15 }
 0x4ee   :  { %v1820_v17 = vpop.f32.mrf.mxu0 }
 0x4ef   :  { %1566 = vsyncpa [#allocation3], 1 }
 0x4f0   :  { %1567 = vsyncpa [#allocation5], 1 }
 0x4f1   :  { %1568 = vsyncpa [#allocation8], 1 }

</bundles_post_ra>
